<compile_context>
chip_gen: v5e
topology: v5e:2x2
jax: 0.10.0
libtpu: 0.0.40
codegen_flags: <defaults>
</compile_context>

<pallas_src>
import jax
import jax.numpy as jnp
from jax.experimental import pallas as pl
from jax.experimental.pallas import tpu as pltpu

NEG_SLOPE = 0.01   # PyTorch nn.LeakyReLU default
MXU_ROWS = 256     # MXU systolic height on v6e/v7x


def _round_up(n, m):
    return ((n + m - 1) // m) * m


def _leaky_relu(x):
    # mul + max (2 VPU ops) instead of cmp + mul + select.
    return jnp.maximum(x, NEG_SLOPE * x)


def dqn_mlp_kernel(x_ref,
                   w1_ref, b1_ref,
                   w2_ref, b2_ref,
                   w3_ref, b3_ref,
                   w4_ref, b4_ref,
                   o_ref):
    """One batch tile through the full 4-layer MLP: MXU matmuls + VPU LeakyReLU.

    Weights may be bf16 (MXU-native on v6e/v7x); accumulation and all
    post-matmul math (bias add, LeakyReLU) stay in f32.
    """
    wdt = w1_ref.dtype

    h = jnp.dot(x_ref[...].astype(wdt), w1_ref[...],
                preferred_element_type=jnp.float32) + b1_ref[...]
    h = _leaky_relu(h)

    h = jnp.dot(h.astype(wdt), w2_ref[...],
                preferred_element_type=jnp.float32) + b2_ref[...]
    h = _leaky_relu(h)

    h = jnp.dot(h.astype(wdt), w3_ref[...],
                preferred_element_type=jnp.float32) + b3_ref[...]
    h = _leaky_relu(h)

    out = jnp.dot(h.astype(wdt), w4_ref[...],
                  preferred_element_type=jnp.float32) + b4_ref[...]
    o_ref[...] = out.astype(o_ref.dtype)


def _choose_tile_b(batch, tile_b):
    """Pick the batch tile size (static Python).

    Tiny batches (<=256 padded rows): one sublane-aligned tile.
    Large batches: a multiple of 256 (MXU systolic height), capped by
    `tile_b`, kept to >= 2 grid steps (2-TC sharding on v7x) and with bounded
    batch-padding waste.
    """
    b8 = _round_up(batch, 8)
    if b8 <= MXU_ROWS:
        return b8
    # Keep at least 2 grid steps and respect the caller's cap.
    cap = max(MXU_ROWS,
              min(_round_up(max(tile_b, MXU_ROWS), MXU_ROWS),
                  _round_up(pl.cdiv(b8, 2), MXU_ROWS)))
    best = MXU_ROWS
    max_waste = max(MXU_ROWS, b8 // 8)   # <= ~12.5% padded rows
    for tb in range(MXU_ROWS, cap + 1, MXU_ROWS):
        waste = _round_up(b8, tb) - b8
        if waste <= max_waste:
            best = tb
    return best


def dqn_forward(x, params, *, tile_b=2048, weights_dtype=jnp.bfloat16):
    """Forward pass of the DQN MLP.

    params = ((w1, b1), (w2, b2), (w3, b3), (w4, b4)); weights are [in, out]
    (transposed relative to PyTorch), biases are [1, out] float32.
    """
    (w1, b1), (w2, b2), (w3, b3), (w4, b4) = params
    batch, obs = x.shape
    hidden = w1.shape[1]
    actions = w4.shape[1]

    # --- Optional bf16 weights (MXU-native on v6e/v7x); biases stay f32.
    w1c = w1.astype(weights_dtype)
    w2c = w2.astype(weights_dtype)
    w3c = w3.astype(weights_dtype)
    w4c = w4.astype(weights_dtype)
    b1c = b1.astype(jnp.float32)
    b2c = b2.astype(jnp.float32)
    b3c = b3.astype(jnp.float32)
    b4c = b4.astype(jnp.float32)

    # --- Batch tiling.
    tb = _choose_tile_b(batch, tile_b)
    b_pad = _round_up(batch, tb)
    if b_pad != batch:
        x = jnp.pad(x, ((0, b_pad - batch), (0, 0)))
    grid = (b_pad // tb,)

    const = lambda i: (0, 0)  # weights/biases resident across grid steps

    # --- Cost hint so XLA overlaps the custom call with surrounding ops.
    w_bytes = jnp.dtype(weights_dtype).itemsize
    flops = 2 * b_pad * (obs * hidden + 2 * hidden * hidden + hidden * actions)
    bytes_accessed = (
        b_pad * obs * 4
        + (obs * hidden + 2 * hidden * hidden + hidden * actions) * w_bytes
        + (3 * hidden + actions) * 4
        + b_pad * actions * 4
    )
    cost = pl.CostEstimate(flops=int(flops), transcendentals=0,
                           bytes_accessed=int(bytes_accessed))

    out = pl.pallas_call(
        dqn_mlp_kernel,
        out_shape=jax.ShapeDtypeStruct((b_pad, actions), jnp.float32),
        grid_spec=pltpu.PrefetchScalarGridSpec(
            num_scalar_prefetch=0,
            grid=grid,
            in_specs=[
                pl.BlockSpec((tb, obs), lambda i: (i, 0)),     # x: batch-tiled
                pl.BlockSpec((obs, hidden), const),            # w1
                pl.BlockSpec((1, hidden), const),              # b1
                pl.BlockSpec((hidden, hidden), const),         # w2
                pl.BlockSpec((1, hidden), const),              # b2
                pl.BlockSpec((hidden, hidden), const),         # w3
                pl.BlockSpec((1, hidden), const),               # b3
                pl.BlockSpec((hidden, actions), const),         # w4
                pl.BlockSpec((1, actions), const),              # b4
            ],
            out_specs=pl.BlockSpec((tb, actions), lambda i: (i, 0)),
        ),
        compiler_params=pltpu.CompilerParams(
            # Batch axis is embarrassingly parallel -> 2-TC sharding on v7x.
            dimension_semantics=("parallel",),
        ),
        cost_estimate=cost,
    )(x, w1c, b1c, w2c, b2c, w3c, b3c, w4c, b4c)

    # Strip batch padding only (output is already actions-wide, no lane pad).
    return out[:batch]


def init_linear(key, fan_in, fan_out):
    """Mimics torch.nn.Linear default init: U(-1/sqrt(fan_in), +1/sqrt(fan_in))."""
    kw, kb = jax.random.split(key)
    bound = 1.0 / jnp.sqrt(jnp.float32(fan_in))
    w = jax.random.uniform(kw, (fan_in, fan_out), jnp.float32, -bound, bound)
    b = jax.random.uniform(kb, (1, fan_out), jnp.float32, -bound, bound)
    return w, b


def ref_forward(x, params, weights_dtype=jnp.float32):
    """Pure-JAX reference mirroring the kernel's dtype handling."""
    h = x
    n = len(params)
    for i, (w, b) in enumerate(params):
        h = jnp.dot(h.astype(weights_dtype), w.astype(weights_dtype),
                    preferred_element_type=jnp.float32) + b.astype(jnp.float32)
        if i < n - 1:
            h = jnp.maximum(h, NEG_SLOPE * h)
    return h


if __name__ == "__main__":
    # Shapes consistent with the QMDP DQN: small obs, 4 actions, H=64.
    observation_space = 16
    action_space = 4
    neurons_per_layer = 64

    key = jax.random.PRNGKey(0)
    k_x1, k_x2, k1, k2, k3, k4 = jax.random.split(key, 6)

    params = (
        init_linear(k1, observation_space, neurons_per_layer),
        init_linear(k2, neurons_per_layer, neurons_per_layer),
        init_linear(k3, neurons_per_layer, neurons_per_layer),
        init_linear(k4, neurons_per_layer, action_space),
    )

    # --- Case 1: tiny batch, f32 weights (exact match to the module math).
    x1 = jax.random.normal(k_x1, (8, observation_space), jnp.float32)
    out1 = jax.block_until_ready(
        dqn_forward(x1, params, weights_dtype=jnp.float32))
    exp1 = ref_forward(x1, params, jnp.float32)
    assert out1.shape == (8, action_space)
    assert jnp.allclose(out1, exp1, atol=1e-5, rtol=1e-5), "f32 path mismatch"

    # --- Case 2: larger replay-style batch, defaults (bf16 weights,
    #     multi-step batch grid, 256-row MXU-aligned tiles, batch padding).
    x2 = jax.random.normal(k_x2, (520, observation_space), jnp.float32)
    out2 = jax.block_until_ready(dqn_forward(x2, params))
    exp2 = ref_forward(x2, params, jnp.bfloat16)
    assert out2.shape == (520, action_space)
    assert jnp.allclose(out2, exp2, atol=1e-2, rtol=1e-2), "bf16 path mismatch"

    print("KERNEL_OK")
</pallas_src>

<mosaic_0001>
module attributes {stable_mosaic.version = 11 : i64} {
  func.func @dqn_mlp_kernel(%arg0: i32, %arg1: memref<8x16xf32, #tpu.memory_space<vmem>>, %arg2: memref<16x64xf32, #tpu.memory_space<vmem>>, %arg3: memref<1x64xf32, #tpu.memory_space<vmem>>, %arg4: memref<64x64xf32, #tpu.memory_space<vmem>>, %arg5: memref<1x64xf32, #tpu.memory_space<vmem>>, %arg6: memref<64x64xf32, #tpu.memory_space<vmem>>, %arg7: memref<1x64xf32, #tpu.memory_space<vmem>>, %arg8: memref<64x4xf32, #tpu.memory_space<vmem>>, %arg9: memref<1x4xf32, #tpu.memory_space<vmem>>, %arg10: memref<8x4xf32, #tpu.memory_space<vmem>>) attributes {dimension_semantics = [#tpu.dimension_semantics<parallel>], iteration_bounds = array<i64: 1>, scalar_prefetch = 0 : i64, scratch_operands = 0 : i64, tpu.core_type = #tpu.core_type<tc>, window_params = [{transform_indices = @transform_0, window_bounds = array<i64: 8, 16>}, {pipeline_mode = #tpu.pipeline_mode<synchronous>, transform_indices = @transform_1, window_bounds = array<i64: 16, 64>}, {pipeline_mode = #tpu.pipeline_mode<synchronous>, transform_indices = @transform_2, window_bounds = array<i64: 1, 64>}, {pipeline_mode = #tpu.pipeline_mode<synchronous>, transform_indices = @transform_3, window_bounds = array<i64: 64, 64>}, {pipeline_mode = #tpu.pipeline_mode<synchronous>, transform_indices = @transform_4, window_bounds = array<i64: 1, 64>}, {pipeline_mode = #tpu.pipeline_mode<synchronous>, transform_indices = @transform_5, window_bounds = array<i64: 64, 64>}, {pipeline_mode = #tpu.pipeline_mode<synchronous>, transform_indices = @transform_6, window_bounds = array<i64: 1, 64>}, {pipeline_mode = #tpu.pipeline_mode<synchronous>, transform_indices = @transform_7, window_bounds = array<i64: 64, 4>}, {pipeline_mode = #tpu.pipeline_mode<synchronous>, transform_indices = @transform_8, window_bounds = array<i64: 1, 4>}, {transform_indices = @transform_9, window_bounds = array<i64: 8, 4>}]} {
    %c0 = arith.constant 0 : index
    %c0_0 = arith.constant 0 : index
    %0 = vector.load %arg1[%c0, %c0_0] : memref<8x16xf32, #tpu.memory_space<vmem>>, vector<8x16xf32>
    %c0_1 = arith.constant 0 : index
    %c0_2 = arith.constant 0 : index
    %1 = vector.load %arg2[%c0_1, %c0_2] : memref<16x64xf32, #tpu.memory_space<vmem>>, vector<16x64xf32>
    %cst = arith.constant dense<0.000000e+00> : vector<8x64xf32>
    %2 = tpu.matmul %0, %1, %cst {dimension_numbers = #tpu.dot_dimension_numbers<[1], [0], [0], [1], [0, 0, 1, 1], [], []>} : vector<8x16xf32>, vector<16x64xf32>, vector<8x64xf32> -> vector<8x64xf32>
    %c0_3 = arith.constant 0 : index
    %c0_4 = arith.constant 0 : index
    %3 = vector.load %arg3[%c0_3, %c0_4] : memref<1x64xf32, #tpu.memory_space<vmem>>, vector<1x64xf32>
    %4 = vector.broadcast %3 : vector<1x64xf32> to vector<8x64xf32>
    %5 = arith.addf %2, %4 : vector<8x64xf32>
    %cst_5 = arith.constant 0.00999999977 : f32
    %6 = vector.broadcast %cst_5 : f32 to vector<8x64xf32>
    %7 = arith.mulf %6, %5 : vector<8x64xf32>
    %8 = arith.maximumf %5, %7 : vector<8x64xf32>
    %c0_6 = arith.constant 0 : index
    %c0_7 = arith.constant 0 : index
    %9 = vector.load %arg4[%c0_6, %c0_7] : memref<64x64xf32, #tpu.memory_space<vmem>>, vector<64x64xf32>
    %cst_8 = arith.constant dense<0.000000e+00> : vector<8x64xf32>
    %10 = tpu.matmul %8, %9, %cst_8 {dimension_numbers = #tpu.dot_dimension_numbers<[1], [0], [0], [1], [0, 0, 1, 1], [], []>} : vector<8x64xf32>, vector<64x64xf32>, vector<8x64xf32> -> vector<8x64xf32>
    %c0_9 = arith.constant 0 : index
    %c0_10 = arith.constant 0 : index
    %11 = vector.load %arg5[%c0_9, %c0_10] : memref<1x64xf32, #tpu.memory_space<vmem>>, vector<1x64xf32>
    %12 = vector.broadcast %11 : vector<1x64xf32> to vector<8x64xf32>
    %13 = arith.addf %10, %12 : vector<8x64xf32>
    %cst_11 = arith.constant 0.00999999977 : f32
    %14 = vector.broadcast %cst_11 : f32 to vector<8x64xf32>
    %15 = arith.mulf %14, %13 : vector<8x64xf32>
    %16 = arith.maximumf %13, %15 : vector<8x64xf32>
    %c0_12 = arith.constant 0 : index
    %c0_13 = arith.constant 0 : index
    %17 = vector.load %arg6[%c0_12, %c0_13] : memref<64x64xf32, #tpu.memory_space<vmem>>, vector<64x64xf32>
    %cst_14 = arith.constant dense<0.000000e+00> : vector<8x64xf32>
    %18 = tpu.matmul %16, %17, %cst_14 {dimension_numbers = #tpu.dot_dimension_numbers<[1], [0], [0], [1], [0, 0, 1, 1], [], []>} : vector<8x64xf32>, vector<64x64xf32>, vector<8x64xf32> -> vector<8x64xf32>
    %c0_15 = arith.constant 0 : index
    %c0_16 = arith.constant 0 : index
    %19 = vector.load %arg7[%c0_15, %c0_16] : memref<1x64xf32, #tpu.memory_space<vmem>>, vector<1x64xf32>
    %20 = vector.broadcast %19 : vector<1x64xf32> to vector<8x64xf32>
    %21 = arith.addf %18, %20 : vector<8x64xf32>
    %cst_17 = arith.constant 0.00999999977 : f32
    %22 = vector.broadcast %cst_17 : f32 to vector<8x64xf32>
    %23 = arith.mulf %22, %21 : vector<8x64xf32>
    %24 = arith.maximumf %21, %23 : vector<8x64xf32>
    %c0_18 = arith.constant 0 : index
    %c0_19 = arith.constant 0 : index
    %25 = vector.load %arg8[%c0_18, %c0_19] : memref<64x4xf32, #tpu.memory_space<vmem>>, vector<64x4xf32>
    %cst_20 = arith.constant dense<0.000000e+00> : vector<8x4xf32>
    %26 = tpu.matmul %24, %25, %cst_20 {dimension_numbers = #tpu.dot_dimension_numbers<[1], [0], [0], [1], [0, 0, 1, 1], [], []>} : vector<8x64xf32>, vector<64x4xf32>, vector<8x4xf32> -> vector<8x4xf32>
    %c0_21 = arith.constant 0 : index
    %c0_22 = arith.constant 0 : index
    %27 = vector.load %arg9[%c0_21, %c0_22] : memref<1x4xf32, #tpu.memory_space<vmem>>, vector<1x4xf32>
    %28 = vector.broadcast %27 : vector<1x4xf32> to vector<8x4xf32>
    %29 = arith.addf %26, %28 : vector<8x4xf32>
    %c0_23 = arith.constant 0 : index
    %c0_24 = arith.constant 0 : index
    %30 = vector.load %arg10[%c0_23, %c0_24] : memref<8x4xf32, #tpu.memory_space<vmem>>, vector<8x4xf32>
    tpu.vector_store %arg10[%c0_23, %c0_24], %29 {strides = array<i32>} : memref<8x4xf32, #tpu.memory_space<vmem>>, vector<8x4xf32>,
    return
  }
  func.func @transform_0(%arg0: i32) -> (i32, i32) {
    %c0_i32 = arith.constant 0 : i32
    %c0_i32_0 = arith.constant 0 : i32
    return %arg0, %c0_i32 : i32, i32
  }
  func.func @transform_1(%arg0: i32) -> (i32, i32) {
    %c0_i32 = arith.constant 0 : i32
    %c0_i32_0 = arith.constant 0 : i32
    %c0_i32_1 = arith.constant 0 : i32
    return %c0_i32, %c0_i32_0 : i32, i32
  }
  func.func @transform_2(%arg0: i32) -> (i32, i32) {
    %c0_i32 = arith.constant 0 : i32
    %c0_i32_0 = arith.constant 0 : i32
    %c0_i32_1 = arith.constant 0 : i32
    return %c0_i32, %c0_i32_0 : i32, i32
  }
  func.func @transform_3(%arg0: i32) -> (i32, i32) {
    %c0_i32 = arith.constant 0 : i32
    %c0_i32_0 = arith.constant 0 : i32
    %c0_i32_1 = arith.constant 0 : i32
    return %c0_i32, %c0_i32_0 : i32, i32
  }
  func.func @transform_4(%arg0: i32) -> (i32, i32) {
    %c0_i32 = arith.constant 0 : i32
    %c0_i32_0 = arith.constant 0 : i32
    %c0_i32_1 = arith.constant 0 : i32
    return %c0_i32, %c0_i32_0 : i32, i32
  }
  func.func @transform_5(%arg0: i32) -> (i32, i32) {
    %c0_i32 = arith.constant 0 : i32
    %c0_i32_0 = arith.constant 0 : i32
    %c0_i32_1 = arith.constant 0 : i32
    return %c0_i32, %c0_i32_0 : i32, i32
  }
  func.func @transform_6(%arg0: i32) -> (i32, i32) {
    %c0_i32 = arith.constant 0 : i32
    %c0_i32_0 = arith.constant 0 : i32
    %c0_i32_1 = arith.constant 0 : i32
    return %c0_i32, %c0_i32_0 : i32, i32
  }
  func.func @transform_7(%arg0: i32) -> (i32, i32) {
    %c0_i32 = arith.constant 0 : i32
    %c0_i32_0 = arith.constant 0 : i32
    %c0_i32_1 = arith.constant 0 : i32
    return %c0_i32, %c0_i32_0 : i32, i32
  }
  func.func @transform_8(%arg0: i32) -> (i32, i32) {
    %c0_i32 = arith.constant 0 : i32
    %c0_i32_0 = arith.constant 0 : i32
    %c0_i32_1 = arith.constant 0 : i32
    return %c0_i32, %c0_i32_0 : i32, i32
  }
  func.func @transform_9(%arg0: i32) -> (i32, i32) {
    %c0_i32 = arith.constant 0 : i32
    %c0_i32_0 = arith.constant 0 : i32
    return %arg0, %c0_i32 : i32, i32
  }
}

</mosaic_0001>

<bundles_post_ra>
// kernel: tpu_custom_call.1
= control target key start
LH: loop header
LB: loop body
LE: loop exit
PB: predicated region body
PF: predicated region fallthrough
CT: control target
= control target key end

     0   :  { %14 = vsyncpa [#allocation3], 0  ;;  %s447_s0 = inlined_call_operand.hbm [shape: f32[8,16], index: 0, kind: input, shape index: {}]   ;;  %s448_s1 = inlined_call_operand.hbm [shape: f32[16,64], index: 1, kind: input, shape index: {}]   ;;  %s449_s2 = inlined_call_operand.vmem [shape: f32[1,64], index: 2, kind: input, shape index: {}]   ;;  %s450_s3 = inlined_call_operand.vmem [shape: f32[64,64], index: 3, kind: input, shape index: {}]   ;;  %s451_s4 = inlined_call_operand.vmem [shape: f32[1,64], index: 4, kind: input, shape index: {}]   ;;  %s452_s5 = inlined_call_operand.hbm [shape: f32[64,64], index: 5, kind: input, shape index: {}]   ;;  %s453_s6 = inlined_call_operand.vmem [shape: f32[1,64], index: 6, kind: input, shape index: {}]   ;;  %s454_s7 = inlined_call_operand.vmem [shape: f32[64,4], index: 7, kind: input, shape index: {}]   ;;  %s455_s8 = inlined_call_operand.vmem [shape: f32[1,4], index: 8, kind: input, shape index: {}]   ;;  %s456_s9 = inlined_call_operand.vmem [shape: f32[8,4], index: 9, kind: output, shape index: {}]  }
   0x1   :  { %15 = vsyncpa [#allocation5], 0  ;;  %s31_s11 = sshll.u32 %s448_s1, 4  ;;  %s317_s12 = smov [#allocation4]   ;;  %s32_s11 = int_to_ptr.hbm [resolvable:$true] %s31_s11 }
   0x2   :  { %s33_s13 = sshll.u32 %s317_s12, 4  ;;  %s21_s16 = sshll.u32 %s447_s0, 4  ;;  %s34_s13 = int_to_ptr.vmem [resolvable:$true] %s33_s13  ;;  %s22_s16 = int_to_ptr.hbm [resolvable:$true] %s21_s16 }
   0x3   :  { %s318_s17 = smov 128   ;;  %s319_s18 = smov 8  }
   0x4   :  { %39 = dma.hbm_to_vmem [thread:$0]  %s32_s11, 256, %s34_s13, [#allocation5], %s318_s17, %s318_s17, %s319_s18  }
   0x5   :  { %s320_s19 = smov [#allocation2]   ;;  %s50_s23 = sshll.u32 %s452_s5, 4  ;;  %s51_s23 = int_to_ptr.hbm [resolvable:$true] %s50_s23 }
   0x6   :  { %s23_s20 = sshll.u32 %s320_s19, 4  ;;  %s321_s1 = smov [#allocation6]   ;;  %s24_s20 = int_to_ptr.vmem [resolvable:$true] %s23_s20 }
   0x7   :  { %26 = dma.hbm_to_vmem [thread:$0]  %s22_s16, 128, %s24_s20, [#allocation3]  }
   0x8   :  { %s52_s24 = sshll.u32 %s321_s1, 4  ;;  %s53_s24 = int_to_ptr.vmem [resolvable:$true] %s52_s24 }
   0x9   :  { %58 = dma.hbm_to_vmem [thread:$0]  %s51_s23, 1024, %s53_s24, [#allocation5], %s318_s17, %s318_s17, %s319_s18  }
   0xa   :  { %313 = dma.done.wait [#allocation3], 128  }
   0xb   :  { %314 = vsyncadd [#allocation3], 4294967168 }
   0xc   :  { %315 = dma.done.wait [#allocation5], 1280  }
   0xd   :  { %316 = vsyncadd [#allocation5], 4294966016  ;;  %v79_v0 = vld [vmem:[#allocation4 + $0x8] sm:$0xff]  ;;  %v78_v1 = vld [vmem:[#allocation4] sm:$0xff]  ;;  %vm84_vm0 = vcmask 130048   ;;  %vm122_vm1 = vcmask 523264  }
   0xe   :  { %102 = vmatpush.msra.mxu0 %v79_v0  ;;  %v77_v2 = vld [vmem:[#allocation2] sm:$0xff]  ;;  %v117_v3 = vld [vmem:[%s450_s3 + $0x38] sm:$0xff]  ;;  %v116_v4 = vld [vmem:[%s450_s3 + $0x30] sm:$0xff]  ;;  %vm220_vm2 = vcmask 31744  }
   0xf   :  { %134 = vmatpush.msra.mxu1 %v117_v3  ;;  %v115_v5 = vld [vmem:[%s450_s3 + $0x28] sm:$0xff]  ;;  %v114_v6 = vld [vmem:[%s450_s3 + $0x20] sm:$0xff]  ;;  %v113_v7 = vld [vmem:[%s450_s3 + $0x18] sm:$0xff] }
  0x10   :  { %103 = vmatpush.msra.mxu0 %v78_v1  ;;  %v112_v8 = vld [vmem:[%s450_s3 + $0x10] sm:$0xff]  ;;  %v111_v9 = vld [vmem:[%s450_s3 + $0x8] sm:$0xff]  ;;  %v110_v10 = vld [vmem:[%s450_s3] sm:$0xff] }
  0x11   :  { %228 = vmatmul.msk.f32.vlgmr.msra.gmra.mxu0 %vm84_vm0, %v77_v2  ;;  %135 = vmatpush.msra.mxu1 %v116_v4  ;;  %v155_v11 = vld [vmem:[#allocation6 + $0x38] sm:$0xff]  ;;  %v154_v12 = vld [vmem:[#allocation6 + $0x30] sm:$0xff]  ;;  %v153_v13 = vld [vmem:[#allocation6 + $0x28] sm:$0xff] }
  0x12   :  { %171 = vmatpush.msra.mxu2 %v155_v11  ;;  %v152_v14 = vld [vmem:[#allocation6 + $0x20] sm:$0xff]  ;;  %v237_v15 = vld [vmem:[%s449_s2] ss:$0 sm:$0xff]  ;;  %v151_v20 = vld [vmem:[#allocation6 + $0x18] sm:$0xff] }
  0x13   :  { %136 = vmatpush.msra.mxu1 %v115_v5  ;;  %v150_v21 = vld [vmem:[#allocation6 + $0x10] sm:$0xff]  ;;  %v149_v22 = vld [vmem:[#allocation6 + $0x8] sm:$0xff]  ;;  %v148_v23 = vld [vmem:[#allocation6] sm:$0xff] }
  0x14   :  { %172 = vmatpush.msra.mxu2 %v154_v12  ;;  %v192_v24 = vld [vmem:[%s454_s7 + $0x38] sm:$0xff]  ;;  %v191_v25 = vld [vmem:[%s454_s7 + $0x30] sm:$0xff]  ;;  %v190_v26 = vld [vmem:[%s454_s7 + $0x28] sm:$0xff] }
  0x15   :  { %137 = vmatpush.msra.mxu1 %v114_v6  ;;  %208 = vmatpush.msra.mxu3 %v192_v24  ;;  %v189_v27 = vld [vmem:[%s454_s7 + $0x20] sm:$0xff]  ;;  %v188_v33 = vld [vmem:[%s454_s7 + $0x18] sm:$0xff]  ;;  %v187_v34 = vld [vmem:[%s454_s7 + $0x10] sm:$0xff] }
  0x16   :  { %173 = vmatpush.msra.mxu2 %v153_v13  ;;  %v238_v28 = vld [vmem:[%s451_s4] ss:$0 sm:$0xff]  ;;  %v186_v35 = vld [vmem:[%s454_s7 + $0x8] sm:$0xff] }
  0x17   :  { %138 = vmatpush.msra.mxu1 %v113_v7  ;;  %209 = vmatpush.msra.mxu3 %v191_v25  ;;  %v185_v36 = vld [vmem:[%s454_s7] sm:$0xff] }
  0x18   :  { %174 = vmatpush.msra.mxu2 %v152_v14  ;;  %v239_v37 = vld [vmem:[%s453_s6] ss:$0 sm:$0xff] }
  0x19   :  { %139 = vmatpush.msra.mxu1 %v112_v8  ;;  %210 = vmatpush.msra.mxu3 %v190_v26  ;;  %v240_v42 = vld [vmem:[%s455_s8] ss:$0 sm:$0xff] }
  0x1a   :  { %175 = vmatpush.msra.mxu2 %v151_v20 }
  0x1b   :  { %140 = vmatpush.msra.mxu1 %v111_v9  ;;  %211 = vmatpush.msra.mxu3 %v189_v27 }
  0x1c   :  { %176 = vmatpush.msra.mxu2 %v150_v21 }
  0x1d   :  { %141 = vmatpush.msra.mxu1 %v110_v10  ;;  %212 = vmatpush.msra.mxu3 %v188_v33 }
  0x1e   :  { %177 = vmatpush.msra.mxu2 %v149_v22 }
  0x1f   :  { %213 = vmatpush.msra.mxu3 %v187_v34 }
  0x20   :  { %178 = vmatpush.msra.mxu2 %v148_v23 }
  0x21   :  { %214 = vmatpush.msra.mxu3 %v186_v35 }
  0x23   :  { %215 = vmatpush.msra.mxu3 %v185_v36 }
  0x8e   :  { %v105_v16 = vpop.f32.mrf.mxu0 }
  0x8f   :  { %v106_v17 = vadd.f32 %v237_v15, %v105_v16 }
  0x91   :  { %v108_v18 = vmul.f32 0.01, %v106_v17 }
  0x93   :  { %v109_v19 = vmax.f32 %v106_v17, %v108_v18 }
  0x95   :  { %229 = vmatmul.msk.f32.vlgmr.msra.gmra.mxu1 %vm122_vm1, %v109_v19 }
 0x112   :  { %v143_v29 = vpop.f32.mrf.mxu1 }
 0x113   :  { %v144_v30 = vadd.f32 %v238_v28, %v143_v29 }
 0x115   :  { %v146_v31 = vmul.f32 0.01, %v144_v30 }
 0x117   :  { %v147_v32 = vmax.f32 %v144_v30, %v146_v31 }
 0x119   :  { %230 = vmatmul.msk.f32.vlgmr.msra.gmra.mxu2 %vm122_vm1, %v147_v32 }
 0x19c   :  { %v180_v38 = vpop.f32.mrf.mxu2 }
 0x19d   :  { %v181_v39 = vadd.f32 %v239_v37, %v180_v38 }
 0x19f   :  { %v183_v40 = vmul.f32 0.01, %v181_v39 }
 0x1a1   :  { %v184_v41 = vmax.f32 %v181_v39, %v183_v40 }
 0x1a3   :  { %231 = vmatmul.msk.f32.vlgmr.msra.gmra.mxu3 %vm122_vm1, %v184_v41 }
 0x226   :  { %v217_v43 = vpop.f32.mrf.mxu3 }
 0x227   :  { %v218_v44 = vadd.f32 %v240_v42, %v217_v43 }
 0x229   :  { %221 = vst.msk [vmem:[%s456_s9] sm:$0xff] %vm220_vm2, %v218_v44 }
 0x22a   :  { %226 = vsyncpa [#allocation3], 1 }
 0x22b   :  { %227 = vsyncpa [#allocation5], 1 }

</bundles_post_ra>
